<compile_context>
chip_gen: v6e
topology: v6e:2x2x1
jax: 0.10.0
libtpu: 0.0.40
codegen_flags: <defaults>
</compile_context>

<pallas_src>
import functools

import jax
import jax.numpy as jnp
from jax.experimental import pallas as pl
from jax.experimental.pallas import tpu as pltpu

FILL_VALUE = 255.0  # fits float32/bf16/uint8; guarded against int8 below


def _cols_padded(x_rows, *, hp, w, tw, fill, dt):
    """Pad image rows (1, n, w) to full output width (1, n, tw) in registers
    (lane shift by hp via concatenate) so the caller can do ONE dense store."""
    n = x_rows.shape[1]
    cols = []
    if hp > 0:
        cols.append(jnp.full((1, n, hp), fill, dt))
    cols.append(x_rows.astype(dt))
    if hp + w < tw:
        cols.append(jnp.full((1, n, tw - hp - w), fill, dt))
    return jnp.concatenate(cols, axis=-1) if len(cols) > 1 else cols[0]


def _pad_kernel_single(x_ref, o_ref, *, vp, hp, h, w, fill):
    """One output block == one whole padded channel. Fully static geometry,
    assembled in-register and written with a single full store."""
    _, th, tw = o_ref.shape
    dt = o_ref.dtype
    parts = []
    if vp > 0:
        parts.append(jnp.full((1, vp, tw), fill, dt))
    parts.append(_cols_padded(x_ref[...], hp=hp, w=w, tw=tw, fill=fill, dt=dt))
    if vp + h < th:
        parts.append(jnp.full((1, th - vp - h, tw), fill, dt))
    o_ref[...] = jnp.concatenate(parts, axis=1) if len(parts) > 1 else parts[0]


def _pad_kernel_tiled(x_ref, o_ref, *, vp, hp, h, w, tile_h, n_h, fill):
    """Flat grid g = channel * n_h + row_tile.  x_ref is the whole input channel
    (VMEM-resident across its row tiles); o_ref is a (1, tile_h, target_w) tile.
    All boundary-tile geometry is compile-time static; every tile category does
    exactly one dense full-width store."""
    _, _, tw = o_ref.shape
    dt = o_ref.dtype
    g = pl.program_id(0)
    ti = g % n_h                       # output row-tile index within the channel

    ti_top = vp // tile_h              # tile holding the first image row
    ti_bot = (vp + h - 1) // tile_h    # tile holding the last image row

    # ---- pure-fill tiles (entirely above / below the image) ----
    if ti_top > 0 or ti_bot < n_h - 1:
        @pl.when(jnp.logical_or(ti < ti_top, ti > ti_bot))
        def _fill_only():
            o_ref[...] = jnp.full((1, tile_h, tw), fill, dt)

    # ---- top boundary tile (static geometry; also covers image-in-one-tile) ----
    n_fill_top = vp - ti_top * tile_h
    n_img_top = min(tile_h - n_fill_top, h)
    n_fill_rest = tile_h - n_fill_top - n_img_top

    @pl.when(ti == ti_top)
    def _top():
        parts = []
        if n_fill_top > 0:
            parts.append(jnp.full((1, n_fill_top, tw), fill, dt))
        parts.append(_cols_padded(x_ref[:, 0:n_img_top, :],
                                  hp=hp, w=w, tw=tw, fill=fill, dt=dt))
        if n_fill_rest > 0:
            parts.append(jnp.full((1, n_fill_rest, tw), fill, dt))
        o_ref[...] = jnp.concatenate(parts, axis=1) if len(parts) > 1 else parts[0]

    # ---- bottom boundary tile (static geometry), if distinct from the top ----
    if ti_bot > ti_top:
        r0_bot = ti_bot * tile_h
        n_img_bot = vp + h - r0_bot
        x0_bot = r0_bot - vp
        n_fill_bot = tile_h - n_img_bot

        @pl.when(ti == ti_bot)
        def _bot():
            parts = [_cols_padded(x_ref[:, x0_bot:x0_bot + n_img_bot, :],
                                  hp=hp, w=w, tw=tw, fill=fill, dt=dt)]
            if n_fill_bot > 0:
                parts.append(jnp.full((1, n_fill_bot, tw), fill, dt))
            o_ref[...] = jnp.concatenate(parts, axis=1) if len(parts) > 1 else parts[0]

    # ---- fully-inside tiles: dynamic row start, full tile of image rows ----
    if ti_bot > ti_top + 1:
        @pl.when(jnp.logical_and(ti > ti_top, ti < ti_bot))
        def _inside():
            s = ti * tile_h - vp       # >= 0 within this branch
            x_rows = x_ref[:, pl.ds(s, tile_h), :]
            o_ref[...] = _cols_padded(x_rows, hp=hp, w=w, tw=tw, fill=fill, dt=dt)


def my_pad(image_chw, target_shape, *, tile_h=512):
    """Center-pad a CHW image to (target_height, target_width) with 255."""
    target_h, target_w = target_shape
    c, h, w = image_chw.shape
    assert target_h >= h and target_w >= w, "target must be >= input spatial size"
    assert h >= 1 and w >= 1
    dt = jnp.dtype(image_chw.dtype)
    assert dt != jnp.dtype(jnp.int8), "fill value 255 does not fit int8"
    itemsize = dt.itemsize

    hp = (target_w - w) // 2
    vp = (target_h - h) // 2

    out_shape = jax.ShapeDtypeStruct((c, target_h, target_w), image_chw.dtype)
    cost = pl.CostEstimate(
        flops=0, transcendentals=0,
        bytes_accessed=(c * h * w + c * target_h * target_w) * itemsize)

    # dtype-aware sublane multiple: 8 (f32) / 16 (bf16) / 32 (u8)
    sub_mult = 8 * max(1, 4 // itemsize)
    tile_h_eff = max(sub_mult, (tile_h // sub_mult) * sub_mult)

    if target_h <= tile_h_eff:
        # Single row-tile per channel: fully static kernel, block = full channel.
        kernel = functools.partial(_pad_kernel_single,
                                   vp=vp, hp=hp, h=h, w=w, fill=FILL_VALUE)
        grid = (c,)
        in_specs = [pl.BlockSpec((1, h, w), lambda ci: (ci, 0, 0))]
        out_specs = pl.BlockSpec((1, target_h, target_w), lambda ci: (ci, 0, 0))
        vmem_need = (3 * target_h * target_w + 2 * h * w) * itemsize
    else:
        n_h = (target_h + tile_h_eff - 1) // tile_h_eff
        kernel = functools.partial(_pad_kernel_tiled,
                                   vp=vp, hp=hp, h=h, w=w,
                                   tile_h=tile_h_eff, n_h=n_h, fill=FILL_VALUE)
        # Flat parallel grid (c * n_h) -> balanced megacore split on v7x.
        grid = (c * n_h,)
        # Input block index depends only on the channel -> fetched once/channel.
        in_specs = [pl.BlockSpec((1, h, w), lambda g: (g // n_h, 0, 0))]
        out_specs = pl.BlockSpec((1, tile_h_eff, target_w),
                                 lambda g: (g // n_h, g % n_h, 0))
        vmem_need = (3 * tile_h_eff * target_w + 2 * h * w) * itemsize

    vmem_limit = int(min(max(vmem_need + (2 << 20), 32 << 20), 64 << 20))

    return pl.pallas_call(
        kernel,
        out_shape=out_shape,
        grid_spec=pltpu.PrefetchScalarGridSpec(
            num_scalar_prefetch=0,
            grid=grid,
            in_specs=in_specs,
            out_specs=out_specs,
        ),
        compiler_params=pltpu.CompilerParams(
            dimension_semantics=("parallel",),
            vmem_limit_bytes=vmem_limit),
        cost_estimate=cost,
    )(image_chw)


def my_pad_ref(image_chw, target_shape):
    """Pure-JAX reference for correctness checking."""
    target_h, target_w = target_shape
    _, h, w = image_chw.shape
    hp = (target_w - w) // 2
    vp = (target_h - h) // 2
    pad_cfg = ((0, 0), (vp, target_h - h - vp), (hp, target_w - w - hp))
    return jnp.pad(image_chw, pad_cfg, mode="constant",
                   constant_values=jnp.asarray(FILL_VALUE, image_chw.dtype))


if __name__ == "__main__":
    key = jax.random.PRNGKey(0)
    k1, k2, k3 = jax.random.split(key, 3)

    # Case 1: tiny image -> single-tile fully static path. (4,12,10) -> (4,16,16)
    c1, h1, w1 = 4, 12, 10
    tgt1 = (16, 16)
    img1 = jnp.floor(jax.random.uniform(k1, (c1, h1, w1), jnp.float32) * 255.0)
    out1 = jax.block_until_ready(my_pad(img1, tgt1))
    ref1 = my_pad_ref(img1, tgt1)
    assert out1.shape == (c1,) + tgt1, out1.shape
    assert jnp.array_equal(out1, ref1), "mismatch (single-tile path)"

    # Case 2: H-tiled path, tile_h=8 -> 8 row tiles per channel; exercises
    # pure-fill, top-boundary, bottom-boundary, and fully-inside branches.
    c2, h2, w2 = 3, 40, 48
    tgt2 = (64, 64)
    img2 = jnp.floor(jax.random.uniform(k2, (c2, h2, w2), jnp.float32) * 255.0)
    out2 = jax.block_until_ready(my_pad(img2, tgt2, tile_h=8))
    ref2 = my_pad_ref(img2, tgt2)
    assert out2.shape == (c2,) + tgt2, out2.shape
    assert jnp.array_equal(out2, ref2), "mismatch (H-tiled path)"

    # Case 3: non-divisible target_h (44 rows, tile_h=16 -> 3 tiles, last partial)
    # and asymmetric padding widths.
    c3, h3, w3 = 2, 20, 30
    tgt3 = (44, 40)
    img3 = jnp.floor(jax.random.uniform(k3, (c3, h3, w3), jnp.float32) * 255.0)
    out3 = jax.block_until_ready(my_pad(img3, tgt3, tile_h=16))
    ref3 = my_pad_ref(img3, tgt3)
    assert out3.shape == (c3,) + tgt3, out3.shape
    assert jnp.array_equal(out3, ref3), "mismatch (non-divisible H-tiled path)"

    print("KERNEL_OK")
</pallas_src>

<mosaic_0001>
module attributes {stable_mosaic.version = 11 : i64} {
  func.func @_pad_kernel_single(%arg0: i32, %arg1: memref<1x12x10xf32, #tpu.memory_space<vmem>>, %arg2: memref<1x16x16xf32, #tpu.memory_space<vmem>>) attributes {dimension_semantics = [#tpu.dimension_semantics<parallel>], iteration_bounds = array<i64: 4>, scalar_prefetch = 0 : i64, scratch_operands = 0 : i64, tpu.core_type = #tpu.core_type<tc>, window_params = [{transform_indices = @transform_0, window_bounds = array<i64: 1, 12, 10>}, {transform_indices = @transform_1, window_bounds = array<i64: 1, 16, 16>}]} {
    %cst = arith.constant 2.550000e+02 : f32
    %0 = vector.broadcast %cst : f32 to vector<1x2x16xf32>
    %c0 = arith.constant 0 : index
    %c0_0 = arith.constant 0 : index
    %c0_1 = arith.constant 0 : index
    %1 = vector.load %arg1[%c0, %c0_0, %c0_1] : memref<1x12x10xf32, #tpu.memory_space<vmem>>, vector<1x12x10xf32>
    %cst_2 = arith.constant 2.550000e+02 : f32
    %2 = vector.broadcast %cst_2 : f32 to vector<1x12x3xf32>
    %cst_3 = arith.constant 2.550000e+02 : f32
    %3 = vector.broadcast %cst_3 : f32 to vector<1x12x3xf32>
    %4 = tpu.concatenate %2, %1, %3 in 2 : vector<1x12x3xf32>, vector<1x12x10xf32>, vector<1x12x3xf32> -> vector<1x12x16xf32>
    %cst_4 = arith.constant 2.550000e+02 : f32
    %5 = vector.broadcast %cst_4 : f32 to vector<1x2x16xf32>
    %6 = tpu.concatenate %0, %4, %5 in 1 : vector<1x2x16xf32>, vector<1x12x16xf32>, vector<1x2x16xf32> -> vector<1x16x16xf32>
    %c0_5 = arith.constant 0 : index
    %c0_6 = arith.constant 0 : index
    %c0_7 = arith.constant 0 : index
    %7 = vector.load %arg2[%c0_5, %c0_6, %c0_7] : memref<1x16x16xf32, #tpu.memory_space<vmem>>, vector<1x16x16xf32>
    tpu.vector_store %arg2[%c0_5, %c0_6, %c0_7], %6 {strides = array<i32>} : memref<1x16x16xf32, #tpu.memory_space<vmem>>, vector<1x16x16xf32>,
    return
  }
  func.func @transform_0(%arg0: i32) -> (i32, i32, i32) {
    %c0_i32 = arith.constant 0 : i32
    %c0_i32_0 = arith.constant 0 : i32
    %c0_i32_1 = arith.constant 0 : i32
    return %arg0, %c0_i32, %c0_i32_0 : i32, i32, i32
  }
  func.func @transform_1(%arg0: i32) -> (i32, i32, i32) {
    %c0_i32 = arith.constant 0 : i32
    %c0_i32_0 = arith.constant 0 : i32
    %c0_i32_1 = arith.constant 0 : i32
    return %arg0, %c0_i32, %c0_i32_0 : i32, i32, i32
  }
}

</mosaic_0001>

<bundles_post_ra>
// kernel: tpu_custom_call.1
= control target key start
LH: loop header
LB: loop body
LE: loop exit
PB: predicated region body
PF: predicated region fallthrough
CT: control target
= control target key end

     0   :  { %6 = vsyncpa [#allocation3], 0  ;;  %s459_s0 = inlined_call_operand.vmem [shape: f32[4,12,10], index: 0, kind: input, shape index: {}]   ;;  %s460_s1 = inlined_call_operand.hbm [shape: f32[4,16,16], index: 1, kind: output, shape index: {}]  }
   0x1   :  { %8 = vsyncpa [#allocation3 + $0x1], 0  ;;  %s353_s6 = smov 0   ;;  %s355_s7 = smov 0  }
   0x2   :  { %s357_s8 = smov 0   ;;  %s359_s9 = smov 0  }
   0x3 LB: > { %s374_s10 = sadd.s32 4294967295, %s337_s9   ;;  %s221_s11 = sadd.s32 4294967294, %s337_s9   ;;  %s337_s9 = sphi %s359_s9, %s466_s9   ;;  %s333_s8 = sphi %s357_s8, %s465_s8   ;;  %s329_s7 = sphi %s355_s7, %s464_s7   ;;  %s325_s6 = sphi %s353_s6, %s463_s6  }
   0x4   : > { %s378_s12 = sadd.s32 1, %s337_s9   ;;  %s47_s13 = sadd.s32 1, %s333_s8 }
   0x5   : > { %s44_s14 = ssub.s32 %s337_s9, %s378_s12  ;;  %p57_p0 = scmp.ne.s32.totalorder %s333_s8, %s329_s7 }
   0x6   : > { %p45_p1 = scmp.eq.s32.totalorder %s44_s14, 0  ;;  %p58_p2 = scmp.eq.s32.totalorder %s374_s10, 3 }
   0x7   : > { %p63_p3 = scmp.ne.s32.totalorder %s329_s7, %s325_s6  ;;  %p64_p4 = scmp.eq.s32.totalorder %s221_s11, 3 }
   0x8   : > { %s389_s15 = scalar_select %p45_p1, %s333_s8, %s47_s13  }
   0x9   : > { %p391_p5 = por %p58_p2, %p57_p0  ;;  %p395_p6 = por %p64_p4, %p63_p3 }
   0xa   : > { %p224_p7 = scmp.ge.s32.totalorder %s337_s9, 1  ;;  %p90_p8 = scmp.lt.s32.totalorder %s337_s9, 5 }
   0xc   : > { %p91_p9 = pnand %p224_p7, %p90_p8 }
   0xd   : > { %p110_p10 = scmp.lt.s32.totalorder (!%p91_p9), %s374_s10, 3  ;;  %s339_s23 = smov (!%p91_p9), 3  }
   0xe   : > { %94 = sbr.rel (%p91_p9) target bundleno = 163 (0xa3), region = 24  ;;  %s107_s24 = sand.u32 (!%p91_p9), 1, %s329_s7  }
   0xf   : > { %s225_s25 = sshll.u32 (!%p91_p9), %s107_s24, 4  ;;  %s234_s28 = sshll.u32 (!%p91_p9), %s374_s10, 8 }
  0x10   : > { %s109_s26 = scalar_lea.vmem (!%p91_p9), [#allocation2], %s225_s25  ;;  %s415_s2 = scalar_lea.hbm (!%p91_p9), %s460_s1, %s234_s28 }
  0x11   : > { %s159_s27 = sshll.u32 (!%p91_p9), %s109_s26, 4  ;;  %s419_s3 = scalar_lea.sflag (!%p91_p9), [#allocation3], %s107_s24  ;;  %s410_s27 = int_to_ptr.vmem [resolvable:$true] %s159_s27 }
  0x12   : > { %s277_s4 = scalar_lea.vmem (!%p91_p9), %s410_s27, 256  ;;  %s340_s5 = smov (!%p91_p9), [#allocation2]  }
  0x13   : > { %s111_s18 = scalar_select %p110_p10, %s374_s10, 3  ;;  %vm125_vm0 = vcmask 23552   ;;  %vm128_vm1 = vcmask 105472   ;;  %vm133_vm2 = vcmask 1041408   ;;  %vm142_vm3 = vcmask 130048  }
  0x14   : > { %vm140_vm4 = vcmask 1045504   ;;  %p278_p11 = scmp.ne.s32.totalorder %s410_s27, %s277_s4  ;;  %s281_s10 = sshll.u32 %s340_s5, 4  ;;  %s282_s10 = int_to_ptr.vmem [resolvable:$false] %s281_s10 }
  0x15   : > { %s233_s19 = sshll.u32 %s111_s18, 4  ;;  %s283_s11 = scalar_lea.vmem %s282_s10, 512 }
  0x16   : > { %s114_s22 = scalar_lea.vmem %s459_s0, %s233_s19  ;;  %p279_p12 = pnand %p278_p11, %p391_p5 }
  0x17   : > { %v115_v0 = vld [vmem:[%s114_s22] sm:$0xff]  ;;  %v116_v1 = vld [vmem:[%s114_s22 + $0x8] sm:$0xf]  ;;  %p284_p0 = scmp.lt.s32.totalorder %s410_s27, %s282_s10  ;;  %p285_p1 = scmp.lt.s32.totalorder %s283_s11, %s277_s4 }
  0x18   : > { %119 = vrot.lane.b32.xlu0 %v115_v0, %s339_s23  ;;  %p280_p13 = pneg %p279_p12 }
  0x19   : > { %p286_p2 = por %p285_p1, %p284_p0 }
  0x1b   : > { %p287_p3 = pnand %p286_p2, %p280_p13 }
  0x1c   : > { %121 = vrot.lane.b32.xlu0 %v116_v1, %s339_s23 }
  0x8a   : > { %v120_v2 = vpop.permute.xlu0 %119 }
  0x8b   : > { %v126_v3 = vsel %vm125_vm0, 255.0, %v120_v2 }
  0x8c   : > { %v129_v4 = vsel %vm128_vm1, %v126_v3, 255.0 }
  0x8d   : > { %v134_v5 = vrot.slane %v129_v4, 6 }
  0x8e   : > { %v122_v6 = vpop.permute.xlu0 %121 }
  0x8f   : > { %v139_v7 = vsel %vm133_vm2, 255.0, %v134_v5  ;;  %v127_v8 = vsel %vm125_vm0, 255.0, %v122_v6 }
  0x90   : > { %143 = vst.msk [vmem:[%s109_s26] sm:$0xff] %vm142_vm3, %v139_v7  ;;  %v130_v9 = vsel %vm128_vm1, %v127_v8, 255.0 }
  0x91   : > { %v135_v10 = vrot.slane %v130_v9, 6 }
  0x93   : > { %v136_v11 = vsel %vm133_vm2, %v134_v5, %v135_v10 }
  0x94   : > { %v141_v12 = vsel %vm140_vm4, %v136_v11, 255.0 }
  0x95   : > { %144 = vst.msk [vmem:[%s109_s26 + $0x8] sm:$0xff] %vm142_vm3, %v141_v12 }
  0x96   : > { %290 = shalt.err (!%p287_p3)
}
  0x97   : > { %s291_s13 = scalar_lea.hbm %s415_s2, 256  ;;  %s295_s19 = scalar_lea.hbm %s460_s1, 1024 }
  0x98   : > { %p292_p4 = scmp.ne.s32.totalorder %s415_s2, %s291_s13  ;;  %p296_p9 = scmp.lt.s32.totalorder %s415_s2, %s460_s1 }
  0x99   : > { %p297_p10 = scmp.lt.s32.totalorder %s295_s19, %s291_s13 }
  0x9a   : > { %p293_p7 = pnand %p292_p4, %p391_p5 }
  0x9b   : > { %p298_p11 = por %p297_p10, %p296_p9 }
  0x9c   : > { %p294_p8 = pneg %p293_p7 }
  0x9e   : > { %p299_p12 = pnand %p298_p11, %p294_p8 }
  0xa0   : > { %302 = shalt.err (!%p299_p12)
}
  0xa1   : > { %s341_s22 = smov 128   ;;  %s342_s23 = smov 8  }
  0xa2   : > { %235 = dma.vmem_to_hbm [thread:$0]  (%p391_p5), %s410_s27, 256, %s415_s2, %s419_s3, %s341_s22, %s341_s22, %s342_s23  }
  0xa3 PF: > { %p241_p13 = scmp.ge.s32.totalorder %s337_s9, 2  ;;  %s174_s24 = sand.u32 1, %s325_s6  }
  0xa4   : > { %s175_s25 = scalar_lea.sflag [#allocation3], %s174_s24 }
  0xa5   : > { %p238_p0 = pnand %p241_p13, %p395_p6 }
  0xa7   : > { %p239_p1 = pneg %p238_p0 }
  0xa9   : > { %320 = dma.done.wait (%p239_p1), %s175_s25, 256  }
  0xaa   : > { %322 = vsyncadd (%p239_p1), %s175_s25, 4294967040  ;;  %p11_p2 = scmp.ge.s32.totalorder %s378_s12, 6   ;;  %s463_s6 = smov %s329_s7 }
  0xab   : > { %s464_s7 = smov %s333_s8  ;;  %s465_s8 = smov %s389_s15 }
  0xac   : > { %s466_s9 = smov %s378_s12  ;;  %13 = sbr.rel (!%p11_p2) target bundleno = 3 (0x3), region = 59 }
  0xb1   :  { %180 = vsyncpa [#allocation3], 1 }
  0xb2   :  { %182 = vsyncpa [#allocation3 + $0x1], 1 }

</bundles_post_ra>
